<compile_context>
chip_gen: v7x
topology: tpu7x:2x2x1
jax: 0.10.0
libtpu: 0.0.40
codegen_flags: <defaults>
</compile_context>

<pallas_src>
import math
import functools

import jax
import jax.numpy as jnp
from jax.experimental import pallas as pl
from jax.experimental.pallas import tpu as pltpu


NEG_INF = -1e30   # finite additive causal-mask bias: avoids -inf/NaN corner cases


def _layernorm(x, w, b, eps=1e-5):
    """Row-wise LayerNorm in f32 (matches nn.LayerNorm defaults)."""
    x = x.astype(jnp.float32)
    mu = jnp.mean(x, axis=-1, keepdims=True)
    var = jnp.mean(jnp.square(x - mu), axis=-1, keepdims=True)
    return (x - mu) * jax.lax.rsqrt(var + eps) * w + b


# ---------------------------------------------------------------------------
# Kernel 0: fused ln1 + Q/K/V projection, computed once per token tile.
#   grid = (B, T // tp)
# ---------------------------------------------------------------------------
def _qkv_proj_kernel(x_ref, ln1w_ref, ln1b_ref,
                     wq_ref, bq_ref, wk_ref, bk_ref, wv_ref, bv_ref,
                     q_ref, k_ref, v_ref):
    cdt = wq_ref.dtype
    h = _layernorm(x_ref[0], ln1w_ref[...], ln1b_ref[...]).astype(cdt)
    q_ref[0] = (jnp.dot(h, wq_ref[...], preferred_element_type=jnp.float32)
                + bq_ref[...]).astype(q_ref.dtype)
    k_ref[0] = (jnp.dot(h, wk_ref[...], preferred_element_type=jnp.float32)
                + bk_ref[...]).astype(k_ref.dtype)
    v_ref[0] = (jnp.dot(h, wv_ref[...], preferred_element_type=jnp.float32)
                + bv_ref[...]).astype(v_ref.dtype)


# ---------------------------------------------------------------------------
# Kernel 1: x1 = x + proj(attn(Q, K, V))    grid = (B, T//tq, T//tk), kv last
#   Flash-style online softmax over causal KV tiles. Q/K/V are pre-projected.
# ---------------------------------------------------------------------------
def _attn_kernel(x_ref, q_ref, k_ref, v_ref, wp_ref, bp_ref,
                 o_ref,
                 acc_scr, m_scr, l_scr,
                 *, n_head, tq, tk):
    qi = pl.program_id(1)
    ki = pl.program_id(2)
    c = q_ref.shape[-1]
    hd = c // n_head
    scale = 1.0 / math.sqrt(hd)
    cdt = q_ref.dtype                     # MXU operand dtype (bf16)

    # ---- per (batch, q-tile) init: reset online-softmax state ----
    @pl.when(ki == 0)
    def _init():
        m_scr[...] = jnp.full(m_scr.shape, NEG_INF, m_scr.dtype)
        l_scr[...] = jnp.zeros(l_scr.shape, l_scr.dtype)
        acc_scr[...] = jnp.zeros(acc_scr.shape, acc_scr.dtype)

    def _flash_update(use_bias):
        q = q_ref[0]
        k = k_ref[0]
        v = v_ref[0]
        if use_bias:
            rows = qi * tq + jax.lax.broadcasted_iota(jnp.int32, (tq, tk), 0)
            cols = ki * tk + jax.lax.broadcasted_iota(jnp.int32, (tq, tk), 1)
            bias = jnp.where(cols <= rows, 0.0, NEG_INF).astype(jnp.float32)
        for h in range(n_head):           # static unroll over heads
            sl = slice(h * hd, (h + 1) * hd)
            s = jax.lax.dot_general(q[:, sl], k[:, sl],
                                    (((1,), (1,)), ((), ())),
                                    preferred_element_type=jnp.float32) * scale
            if use_bias:
                s = s + bias
            m_prev = m_scr[:, h:h + 1]                       # (tq, 1)
            m_new = jnp.maximum(m_prev, jnp.max(s, axis=-1, keepdims=True))
            alpha = jnp.exp(m_prev - m_new)                  # (tq, 1)
            p = jnp.exp(s - m_new)                           # (tq, tk)
            # running sum stored broadcast over this head's hd lanes
            l_scr[:, sl] = alpha * l_scr[:, sl] + jnp.sum(p, axis=-1, keepdims=True)
            acc_scr[:, sl] = alpha * acc_scr[:, sl] + jnp.dot(
                p.astype(cdt), v[:, sl], preferred_element_type=jnp.float32)
            m_scr[:, h:h + 1] = m_new

    # ---- interior tiles: fully below the diagonal, no masking work needed ----
    @pl.when(ki * tk + tk - 1 <= qi * tq)
    def _interior():
        _flash_update(False)

    # ---- diagonal-straddling tiles: build/apply the causal bias ----
    @pl.when((ki * tk + tk - 1 > qi * tq) & (ki * tk < (qi + 1) * tq))
    def _diagonal():
        _flash_update(True)
    # (fully-masked tiles: neither branch runs; their DMA is skipped via index_map)

    # ---- finalize: normalize, single full-width output projection, residual ----
    @pl.when(ki == pl.num_programs(2) - 1)
    def _finalize():
        inv_l = pl.reciprocal(l_scr[...], approx=True)       # EUP, not VALU
        y = (acc_scr[...] * inv_l).astype(cdt)               # (tq, C), lane-dense
        o_ref[0] = (x_ref[0].astype(jnp.float32)
                    + jnp.dot(y, wp_ref[...], preferred_element_type=jnp.float32)
                    + bp_ref[...])


# ---------------------------------------------------------------------------
# Kernel 2: out = x1 + mlp(ln2(x1))    grid = (B, T//tt); w1/w2 resident in VMEM
# ---------------------------------------------------------------------------
def _mlp_kernel(x_ref, ln2w_ref, ln2b_ref, w1_ref, b1_ref, w2_ref, b2_ref,
                o_ref, *, approx_gelu):
    cdt = w1_ref.dtype
    h = _layernorm(x_ref[0], ln2w_ref[...], ln2b_ref[...]).astype(cdt)
    m = jnp.dot(h, w1_ref[...], preferred_element_type=jnp.float32) + b1_ref[...]
    # approximate=True -> tanh GELU on the EUP; False -> exact erf (nn.GELU parity)
    m = jax.nn.gelu(m, approximate=approx_gelu)
    y = jnp.dot(m.astype(cdt), w2_ref[...], preferred_element_type=jnp.float32)
    o_ref[0] = x_ref[0].astype(jnp.float32) + y + b2_ref[...]


# ---------------------------------------------------------------------------
# Wrappers
# ---------------------------------------------------------------------------
def prepare_params(params, compute_dtype=jnp.bfloat16):
    """One-time weight cast, hoisted out of the per-call path."""
    f32 = jnp.float32
    out = {}
    for k in ("wq", "wk", "wv", "wp", "w1", "w2"):
        out[k] = params[k].astype(compute_dtype)
    for k in ("bq", "bk", "bv", "bp", "b1", "b2",
              "ln1_w", "ln1_b", "ln2_w", "ln2_b"):
        out[k] = params[k].astype(f32)
    return out


def transformer_block(x, params, n_head=8, *,
                      tp=128, tq=128, tk=128, tt=128,
                      approx_gelu=True, vmem_limit_bytes=None):
    """Forward pass of `Block` (inference). x: (B, T, C) f32 -> (B, T, C) f32.

    params must come from prepare_params (weights in the MXU compute dtype).
    Tile notes: 128 matches the v5e MXU; use 256 on v6e/v7x; on v7x re-derive
    vmem_limit_bytes against its 64 MiB VMEM before enlarging tiles.
    """
    B, T, C = x.shape
    assert C % n_head == 0
    H = params["w1"].shape[1]
    cdt = params["wq"].dtype
    f32 = jnp.float32

    tp, tq, tk, tt = (min(t, T) for t in (tp, tq, tk, tt))
    assert T % tp == 0 and T % tq == 0 and T % tk == 0 and T % tt == 0, \
        "sequence length must divide the tile sizes"

    cp2 = pltpu.CompilerParams(dimension_semantics=("parallel", "parallel"),
                               vmem_limit_bytes=vmem_limit_bytes)
    cp3 = pltpu.CompilerParams(
        dimension_semantics=("parallel", "parallel", "arbitrary"),
        vmem_limit_bytes=vmem_limit_bytes)

    def full2(shape):
        return pl.BlockSpec(shape, lambda b, i: (0,) * len(shape))

    def full3(shape):
        return pl.BlockSpec(shape, lambda b, i, j: (0,) * len(shape))

    # ---------------- kernel 0: ln1 + QKV projection (once per token) ----------------
    q, k, v = pl.pallas_call(
        _qkv_proj_kernel,
        out_shape=tuple(jax.ShapeDtypeStruct((B, T, C), cdt) for _ in range(3)),
        grid=(B, T // tp),
        in_specs=[
            pl.BlockSpec((1, tp, C), lambda b, i: (b, i, 0)),      # x
            full2((1, C)), full2((1, C)),                          # ln1 w, b
            full2((C, C)), full2((1, C)),                          # wq, bq
            full2((C, C)), full2((1, C)),                          # wk, bk
            full2((C, C)), full2((1, C)),                          # wv, bv
        ],
        out_specs=tuple(pl.BlockSpec((1, tp, C), lambda b, i: (b, i, 0))
                        for _ in range(3)),
        compiler_params=cp2,
    )(x, params["ln1_w"], params["ln1_b"],
      params["wq"], params["bq"], params["wk"], params["bk"],
      params["wv"], params["bv"])

    # ---------------- kernel 1: x1 = x + attn ----------------
    def kv_map(b, i, j):
        # Clamp fully-masked causal tiles onto the last valid KV tile: the block
        # index repeats across those grid steps, so Pallas skips the DMA.
        last = ((i + 1) * tq - 1) // tk
        return (b, jnp.minimum(j, last), 0)

    x1 = pl.pallas_call(
        functools.partial(_attn_kernel, n_head=n_head, tq=tq, tk=tk),
        out_shape=jax.ShapeDtypeStruct((B, T, C), jnp.float32),
        grid=(B, T // tq, T // tk),
        in_specs=[
            pl.BlockSpec((1, tq, C), lambda b, i, j: (b, i, 0)),   # x (residual)
            pl.BlockSpec((1, tq, C), lambda b, i, j: (b, i, 0)),   # Q (pre-projected)
            pl.BlockSpec((1, tk, C), kv_map),                      # K (pre-projected)
            pl.BlockSpec((1, tk, C), kv_map),                      # V (pre-projected)
            full3((C, C)), full3((1, C)),                          # wp, bp
        ],
        out_specs=pl.BlockSpec((1, tq, C), lambda b, i, j: (b, i, 0)),
        scratch_shapes=[
            pltpu.VMEM((tq, C), jnp.float32),        # acc, heads contiguous on lanes
            pltpu.VMEM((tq, n_head), jnp.float32),   # running max (one column per head)
            pltpu.VMEM((tq, C), jnp.float32),        # running sum, broadcast over hd lanes
        ],
        compiler_params=cp3,
    )(x, q, k, v, params["wp"], params["bp"])

    # ---------------- kernel 2: out = x1 + mlp(ln2(x1)) ----------------
    # w1/w2 kept fully resident in VMEM (no hidden-axis re-streaming).
    # TODO(synk): for very large C*H that exceeds the per-chip VMEM budget (v7x: 64 MiB),
    # fall back to tiling the hidden axis as a trailing "arbitrary" grid dimension.
    out = pl.pallas_call(
        functools.partial(_mlp_kernel, approx_gelu=approx_gelu),
        out_shape=jax.ShapeDtypeStruct((B, T, C), jnp.float32),
        grid=(B, T // tt),
        in_specs=[
            pl.BlockSpec((1, tt, C), lambda b, i: (b, i, 0)),      # x1
            full2((1, C)), full2((1, C)),                          # ln2 w, b
            full2((C, H)), full2((1, H)),                          # w1, b1 (resident)
            full2((H, C)), full2((1, C)),                          # w2, b2 (resident)
        ],
        out_specs=pl.BlockSpec((1, tt, C), lambda b, i: (b, i, 0)),
        compiler_params=cp2,
    )(x1, params["ln2_w"], params["ln2_b"],
      params["w1"], params["b1"], params["w2"], params["b2"])

    return out


# ---------------------------------------------------------------------------
# Parameters & pure-JAX reference (PyTorch semantics, all f32)
# ---------------------------------------------------------------------------
def init_params(key, embed_dim, fc_rate):
    C, H = embed_dim, fc_rate * embed_dim
    ks = jax.random.split(key, 12)

    def lin(kw, kb, din, dout):
        w = jax.random.normal(kw, (din, dout), jnp.float32) * 0.02
        b = jax.random.normal(kb, (1, dout), jnp.float32) * 0.02
        return w, b

    wq, bq = lin(ks[0], ks[1], C, C)
    wk, bk = lin(ks[2], ks[3], C, C)
    wv, bv = lin(ks[4], ks[5], C, C)
    wp, bp = lin(ks[6], ks[7], C, C)
    w1, b1 = lin(ks[8], ks[9], C, H)
    w2, b2 = lin(ks[10], ks[11], H, C)
    return dict(
        ln1_w=jnp.ones((1, C), jnp.float32), ln1_b=jnp.zeros((1, C), jnp.float32),
        ln2_w=jnp.ones((1, C), jnp.float32), ln2_b=jnp.zeros((1, C), jnp.float32),
        wq=wq, bq=bq, wk=wk, bk=bk, wv=wv, bv=bv, wp=wp, bp=bp,
        w1=w1, b1=b1, w2=w2, b2=b2)


def reference_block(x, p, n_head=8):
    def ln(z, w, b):
        mu = z.mean(-1, keepdims=True)
        var = ((z - mu) ** 2).mean(-1, keepdims=True)
        return (z - mu) / jnp.sqrt(var + 1e-5) * w + b

    B, T, C = x.shape
    hd = C // n_head
    h = ln(x, p["ln1_w"], p["ln1_b"])
    q = (h @ p["wq"] + p["bq"]).reshape(B, T, n_head, hd).transpose(0, 2, 1, 3)
    k = (h @ p["wk"] + p["bk"]).reshape(B, T, n_head, hd).transpose(0, 2, 1, 3)
    v = (h @ p["wv"] + p["bv"]).reshape(B, T, n_head, hd).transpose(0, 2, 1, 3)
    att = jnp.einsum("bhqd,bhkd->bhqk", q, k) * (1.0 / math.sqrt(hd))
    mask = jnp.tril(jnp.ones((T, T)))
    att = jnp.where(mask == 0, -jnp.inf, att)
    att = jax.nn.softmax(att, axis=-1)
    y = jnp.einsum("bhqk,bhkd->bhqd", att, v).transpose(0, 2, 1, 3).reshape(B, T, C)
    y = y @ p["wp"] + p["bp"]
    x1 = x + y
    h2 = ln(x1, p["ln2_w"], p["ln2_b"])
    m = jax.nn.gelu(h2 @ p["w1"] + p["b1"], approximate=False)
    m = m @ p["w2"] + p["b2"]
    return x1 + m


# ---------------------------------------------------------------------------
if __name__ == "__main__":
    B, T, C = 2, 32, 128          # batch, sequence (block_size), embed_dim
    n_head, fc_rate = 8, 4        # head_dim = 16, hidden H = 512

    key = jax.random.PRNGKey(0)
    kx, kp = jax.random.split(key)
    x = jax.random.normal(kx, (B, T, C), jnp.float32)
    params = init_params(kp, C, fc_rate)
    prepared = prepare_params(params)   # one-time weight cast (outside the call path)

    # Small tiles so the test exercises the multi-tile flash-KV path
    # (interior / diagonal / clamped-masked tiles) and multiple token tiles.
    out = transformer_block(x, prepared, n_head=n_head, tp=16, tq=16, tk=16, tt=16)
    out = jax.block_until_ready(out)

    ref = reference_block(x, params, n_head=n_head)
    assert out.shape == (B, T, C)
    # bf16 MXU operands + approx softmax reciprocal + tanh GELU vs f32/erf reference.
    assert jnp.allclose(out, ref, rtol=2e-2, atol=2e-2), "mismatch vs reference"

    print("KERNEL_OK")
</pallas_src>

<mosaic_0001>
module attributes {stable_mosaic.version = 11 : i64} {
  func.func @_qkv_proj_kernel(%arg0: i32, %arg1: i32, %arg2: memref<1x16x128xf32, #tpu.memory_space<vmem>>, %arg3: memref<1x128xf32, #tpu.memory_space<vmem>>, %arg4: memref<1x128xf32, #tpu.memory_space<vmem>>, %arg5: memref<128x128xbf16, #tpu.memory_space<vmem>>, %arg6: memref<1x128xf32, #tpu.memory_space<vmem>>, %arg7: memref<128x128xbf16, #tpu.memory_space<vmem>>, %arg8: memref<1x128xf32, #tpu.memory_space<vmem>>, %arg9: memref<128x128xbf16, #tpu.memory_space<vmem>>, %arg10: memref<1x128xf32, #tpu.memory_space<vmem>>, %arg11: memref<1x16x128xbf16, #tpu.memory_space<vmem>>, %arg12: memref<1x16x128xbf16, #tpu.memory_space<vmem>>, %arg13: memref<1x16x128xbf16, #tpu.memory_space<vmem>>) attributes {dimension_semantics = [#tpu.dimension_semantics<parallel>, #tpu.dimension_semantics<parallel>], iteration_bounds = array<i64: 2, 2>, scalar_prefetch = 0 : i64, scratch_operands = 0 : i64, tpu.core_type = #tpu.core_type<tc>, window_params = [{transform_indices = @transform_0, window_bounds = array<i64: 1, 16, 128>}, {pipeline_mode = #tpu.pipeline_mode<synchronous>, transform_indices = @transform_1, window_bounds = array<i64: 1, 128>}, {pipeline_mode = #tpu.pipeline_mode<synchronous>, transform_indices = @transform_2, window_bounds = array<i64: 1, 128>}, {pipeline_mode = #tpu.pipeline_mode<synchronous>, transform_indices = @transform_3, window_bounds = array<i64: 128, 128>}, {pipeline_mode = #tpu.pipeline_mode<synchronous>, transform_indices = @transform_4, window_bounds = array<i64: 1, 128>}, {pipeline_mode = #tpu.pipeline_mode<synchronous>, transform_indices = @transform_5, window_bounds = array<i64: 128, 128>}, {pipeline_mode = #tpu.pipeline_mode<synchronous>, transform_indices = @transform_6, window_bounds = array<i64: 1, 128>}, {pipeline_mode = #tpu.pipeline_mode<synchronous>, transform_indices = @transform_7, window_bounds = array<i64: 128, 128>}, {pipeline_mode = #tpu.pipeline_mode<synchronous>, transform_indices = @transform_8, window_bounds = array<i64: 1, 128>}, {transform_indices = @transform_9, window_bounds = array<i64: 1, 16, 128>}, {transform_indices = @transform_10, window_bounds = array<i64: 1, 16, 128>}, {transform_indices = @transform_11, window_bounds = array<i64: 1, 16, 128>}]} {
    %c0 = arith.constant 0 : index
    %c0_0 = arith.constant 0 : index
    %c0_1 = arith.constant 0 : index
    %0 = vector.load %arg2[%c0, %c0_0, %c0_1] : memref<1x16x128xf32, #tpu.memory_space<vmem>>, vector<1x16x128xf32>
    %1 = vector.shape_cast %0 : vector<1x16x128xf32> to vector<16x128xf32>
    %c0_2 = arith.constant 0 : index
    %c0_3 = arith.constant 0 : index
    %2 = vector.load %arg3[%c0_2, %c0_3] : memref<1x128xf32, #tpu.memory_space<vmem>>, vector<1x128xf32>
    %c0_4 = arith.constant 0 : index
    %c0_5 = arith.constant 0 : index
    %3 = vector.load %arg4[%c0_4, %c0_5] : memref<1x128xf32, #tpu.memory_space<vmem>>, vector<1x128xf32>
    %cst = arith.constant dense<0.000000e+00> : vector<16xf32>
    %4 = vector.multi_reduction <add>, %1, %cst [1] : vector<16x128xf32> to vector<16xf32>
    %5 = vector.shape_cast %4 : vector<16xf32> to vector<16x1xf32>
    %cst_6 = arith.constant 1.280000e+02 : f32
    %6 = vector.broadcast %cst_6 : f32 to vector<16x1xf32>
    %7 = arith.divf %5, %6 : vector<16x1xf32>
    %8 = vector.broadcast %7 : vector<16x1xf32> to vector<16x128xf32>
    %9 = arith.subf %1, %8 : vector<16x128xf32>
    %10 = arith.mulf %9, %9 : vector<16x128xf32>
    %cst_7 = arith.constant dense<0.000000e+00> : vector<16xf32>
    %11 = vector.multi_reduction <add>, %10, %cst_7 [1] : vector<16x128xf32> to vector<16xf32>
    %12 = vector.shape_cast %11 : vector<16xf32> to vector<16x1xf32>
    %cst_8 = arith.constant 1.280000e+02 : f32
    %13 = vector.broadcast %cst_8 : f32 to vector<16x1xf32>
    %14 = arith.divf %12, %13 : vector<16x1xf32>
    %15 = vector.broadcast %7 : vector<16x1xf32> to vector<16x128xf32>
    %16 = arith.subf %1, %15 : vector<16x128xf32>
    %cst_9 = arith.constant 9.99999974E-6 : f32
    %17 = vector.broadcast %cst_9 : f32 to vector<16x1xf32>
    %18 = arith.addf %14, %17 : vector<16x1xf32>
    %19 = math.rsqrt %18 : vector<16x1xf32>
    %20 = vector.broadcast %19 : vector<16x1xf32> to vector<16x128xf32>
    %21 = arith.mulf %16, %20 : vector<16x128xf32>
    %22 = vector.broadcast %2 : vector<1x128xf32> to vector<16x128xf32>
    %23 = arith.mulf %21, %22 : vector<16x128xf32>
    %24 = vector.broadcast %3 : vector<1x128xf32> to vector<16x128xf32>
    %25 = arith.addf %23, %24 : vector<16x128xf32>
    %26 = arith.truncf %25 : vector<16x128xf32> to vector<16x128xbf16>
    %c0_10 = arith.constant 0 : index
    %c0_11 = arith.constant 0 : index
    %27 = vector.load %arg5[%c0_10, %c0_11] : memref<128x128xbf16, #tpu.memory_space<vmem>>, vector<128x128xbf16>
    %cst_12 = arith.constant dense<0.000000e+00> : vector<16x128xf32>
    %28 = tpu.matmul %26, %27, %cst_12 {dimension_numbers = #tpu.dot_dimension_numbers<[1], [0], [0], [1], [0, 0, 1, 1], [], []>} : vector<16x128xbf16>, vector<128x128xbf16>, vector<16x128xf32> -> vector<16x128xf32>
    %c0_13 = arith.constant 0 : index
    %c0_14 = arith.constant 0 : index
    %29 = vector.load %arg6[%c0_13, %c0_14] : memref<1x128xf32, #tpu.memory_space<vmem>>, vector<1x128xf32>
    %30 = vector.broadcast %29 : vector<1x128xf32> to vector<16x128xf32>
    %31 = arith.addf %28, %30 : vector<16x128xf32>
    %32 = arith.truncf %31 : vector<16x128xf32> to vector<16x128xbf16>
    %c0_15 = arith.constant 0 : index
    %c0_16 = arith.constant 0 : index
    %c0_17 = arith.constant 0 : index
    %33 = vector.load %arg11[%c0_15, %c0_16, %c0_17] : memref<1x16x128xbf16, #tpu.memory_space<vmem>>, vector<1x16x128xbf16>
    %34 = vector.shape_cast %33 : vector<1x16x128xbf16> to vector<16x128xbf16>
    %35 = vector.shape_cast %32 : vector<16x128xbf16> to vector<1x16x128xbf16>
    tpu.vector_store %arg11[%c0_15, %c0_16, %c0_17], %35 {strides = array<i32>} : memref<1x16x128xbf16, #tpu.memory_space<vmem>>, vector<1x16x128xbf16>,
    %c0_18 = arith.constant 0 : index
    %c0_19 = arith.constant 0 : index
    %36 = vector.load %arg7[%c0_18, %c0_19] : memref<128x128xbf16, #tpu.memory_space<vmem>>, vector<128x128xbf16>
    %cst_20 = arith.constant dense<0.000000e+00> : vector<16x128xf32>
    %37 = tpu.matmul %26, %36, %cst_20 {dimension_numbers = #tpu.dot_dimension_numbers<[1], [0], [0], [1], [0, 0, 1, 1], [], []>} : vector<16x128xbf16>, vector<128x128xbf16>, vector<16x128xf32> -> vector<16x128xf32>
    %c0_21 = arith.constant 0 : index
    %c0_22 = arith.constant 0 : index
    %38 = vector.load %arg8[%c0_21, %c0_22] : memref<1x128xf32, #tpu.memory_space<vmem>>, vector<1x128xf32>
    %39 = vector.broadcast %38 : vector<1x128xf32> to vector<16x128xf32>
    %40 = arith.addf %37, %39 : vector<16x128xf32>
    %41 = arith.truncf %40 : vector<16x128xf32> to vector<16x128xbf16>
    %c0_23 = arith.constant 0 : index
    %c0_24 = arith.constant 0 : index
    %c0_25 = arith.constant 0 : index
    %42 = vector.load %arg12[%c0_23, %c0_24, %c0_25] : memref<1x16x128xbf16, #tpu.memory_space<vmem>>, vector<1x16x128xbf16>
    %43 = vector.shape_cast %42 : vector<1x16x128xbf16> to vector<16x128xbf16>
    %44 = vector.shape_cast %41 : vector<16x128xbf16> to vector<1x16x128xbf16>
    tpu.vector_store %arg12[%c0_23, %c0_24, %c0_25], %44 {strides = array<i32>} : memref<1x16x128xbf16, #tpu.memory_space<vmem>>, vector<1x16x128xbf16>,
    %c0_26 = arith.constant 0 : index
    %c0_27 = arith.constant 0 : index
    %45 = vector.load %arg9[%c0_26, %c0_27] : memref<128x128xbf16, #tpu.memory_space<vmem>>, vector<128x128xbf16>
    %cst_28 = arith.constant dense<0.000000e+00> : vector<16x128xf32>
    %46 = tpu.matmul %26, %45, %cst_28 {dimension_numbers = #tpu.dot_dimension_numbers<[1], [0], [0], [1], [0, 0, 1, 1], [], []>} : vector<16x128xbf16>, vector<128x128xbf16>, vector<16x128xf32> -> vector<16x128xf32>
    %c0_29 = arith.constant 0 : index
    %c0_30 = arith.constant 0 : index
    %47 = vector.load %arg10[%c0_29, %c0_30] : memref<1x128xf32, #tpu.memory_space<vmem>>, vector<1x128xf32>
    %48 = vector.broadcast %47 : vector<1x128xf32> to vector<16x128xf32>
    %49 = arith.addf %46, %48 : vector<16x128xf32>
    %50 = arith.truncf %49 : vector<16x128xf32> to vector<16x128xbf16>
    %c0_31 = arith.constant 0 : index
    %c0_32 = arith.constant 0 : index
    %c0_33 = arith.constant 0 : index
    %51 = vector.load %arg13[%c0_31, %c0_32, %c0_33] : memref<1x16x128xbf16, #tpu.memory_space<vmem>>, vector<1x16x128xbf16>
    %52 = vector.shape_cast %51 : vector<1x16x128xbf16> to vector<16x128xbf16>
    %53 = vector.shape_cast %50 : vector<16x128xbf16> to vector<1x16x128xbf16>
    tpu.vector_store %arg13[%c0_31, %c0_32, %c0_33], %53 {strides = array<i32>} : memref<1x16x128xbf16, #tpu.memory_space<vmem>>, vector<1x16x128xbf16>,
    return
  }
  func.func @transform_0(%arg0: i32, %arg1: i32) -> (i32, i32, i32) {
    %c0_i32 = arith.constant 0 : i32
    %c0_i32_0 = arith.constant 0 : i32
    return %arg0, %arg1, %c0_i32 : i32, i32, i32
  }
  func.func @transform_1(%arg0: i32, %arg1: i32) -> (i32, i32) {
    %c0_i32 = arith.constant 0 : i32
    %c0_i32_0 = arith.constant 0 : i32
    %c0_i32_1 = arith.constant 0 : i32
    return %c0_i32, %c0_i32_0 : i32, i32
  }
  func.func @transform_2(%arg0: i32, %arg1: i32) -> (i32, i32) {
    %c0_i32 = arith.constant 0 : i32
    %c0_i32_0 = arith.constant 0 : i32
    %c0_i32_1 = arith.constant 0 : i32
    return %c0_i32, %c0_i32_0 : i32, i32
  }
  func.func @transform_3(%arg0: i32, %arg1: i32) -> (i32, i32) {
    %c0_i32 = arith.constant 0 : i32
    %c0_i32_0 = arith.constant 0 : i32
    %c0_i32_1 = arith.constant 0 : i32
    return %c0_i32, %c0_i32_0 : i32, i32
  }
  func.func @transform_4(%arg0: i32, %arg1: i32) -> (i32, i32) {
    %c0_i32 = arith.constant 0 : i32
    %c0_i32_0 = arith.constant 0 : i32
    %c0_i32_1 = arith.constant 0 : i32
    return %c0_i32, %c0_i32_0 : i32, i32
  }
  func.func @transform_5(%arg0: i32, %arg1: i32) -> (i32, i32) {
    %c0_i32 = arith.constant 0 : i32
    %c0_i32_0 = arith.constant 0 : i32
    %c0_i32_1 = arith.constant 0 : i32
    return %c0_i32, %c0_i32_0 : i32, i32
  }
  func.func @transform_6(%arg0: i32, %arg1: i32) -> (i32, i32) {
    %c0_i32 = arith.constant 0 : i32
    %c0_i32_0 = arith.constant 0 : i32
    %c0_i32_1 = arith.constant 0 : i32
    return %c0_i32, %c0_i32_0 : i32, i32
  }
  func.func @transform_7(%arg0: i32, %arg1: i32) -> (i32, i32) {
    %c0_i32 = arith.constant 0 : i32
    %c0_i32_0 = arith.constant 0 : i32
    %c0_i32_1 = arith.constant 0 : i32
    return %c0_i32, %c0_i32_0 : i32, i32
  }
  func.func @transform_8(%arg0: i32, %arg1: i32) -> (i32, i32) {
    %c0_i32 = arith.constant 0 : i32
    %c0_i32_0 = arith.constant 0 : i32
    %c0_i32_1 = arith.constant 0 : i32
    return %c0_i32, %c0_i32_0 : i32, i32
  }
  func.func @transform_9(%arg0: i32, %arg1: i32) -> (i32, i32, i32) {
    %c0_i32 = arith.constant 0 : i32
    %c0_i32_0 = arith.constant 0 : i32
    return %arg0, %arg1, %c0_i32 : i32, i32, i32
  }
  func.func @transform_10(%arg0: i32, %arg1: i32) -> (i32, i32, i32) {
    %c0_i32 = arith.constant 0 : i32
    %c0_i32_0 = arith.constant 0 : i32
    return %arg0, %arg1, %c0_i32 : i32, i32, i32
  }
  func.func @transform_11(%arg0: i32, %arg1: i32) -> (i32, i32, i32) {
    %c0_i32 = arith.constant 0 : i32
    %c0_i32_0 = arith.constant 0 : i32
    return %arg0, %arg1, %c0_i32 : i32, i32, i32
  }
}

</mosaic_0001>

<bundles_post_ra>
// kernel: tpu_custom_call.1
= control target key start
LH: loop header
LB: loop body
LE: loop exit
PB: predicated region body
PF: predicated region fallthrough
CT: control target
= control target key end

     0   :  { %s2283_s0 = inlined_call_operand.hbm [shape: f32[2,32,128], index: 0, kind: input, shape index: {}]   ;;  %s2284_s1 = inlined_call_operand.vmem [shape: f32[1,128], index: 1, kind: input, shape index: {}]   ;;  %s2285_s2 = inlined_call_operand.vmem [shape: f32[1,128], index: 2, kind: input, shape index: {}]   ;;  %s2286_s3 = inlined_call_operand.hbm [shape: bf16[128,128], index: 3, kind: input, shape index: {}]   ;;  %s2287_s4 = inlined_call_operand.vmem [shape: f32[1,128], index: 4, kind: input, shape index: {}]   ;;  %s2288_s5 = inlined_call_operand.hbm [shape: bf16[128,128], index: 5, kind: input, shape index: {}]   ;;  %s2289_s6 = inlined_call_operand.vmem [shape: f32[1,128], index: 6, kind: input, shape index: {}]   ;;  %s2290_s7 = inlined_call_operand.hbm [shape: bf16[128,128], index: 7, kind: input, shape index: {}]   ;;  %s2291_s8 = inlined_call_operand.vmem [shape: f32[1,128], index: 8, kind: input, shape index: {}]   ;;  %s2292_s9 = inlined_call_operand.hbm [shape: bf16[2,32,128], index: 9, kind: output, shape index: {0}]   ;;  %s2293_s10 = inlined_call_operand.hbm [shape: bf16[2,32,128], index: 10, kind: output, shape index: {1}]   ;;  %s2294_s11 = inlined_call_operand.hbm [shape: bf16[2,32,128], index: 11, kind: output, shape index: {2}]  }
   0x1   :  { %2305 = sst [smem:[#allocation23_spill]] %s2286_s3 }
   0x2   :  { %2306 = sst [smem:[#allocation24_spill]] %s2287_s4 }
   0x3   :  { %2307 = sst [smem:[#allocation25_spill]] %s2288_s5 }
   0x4   :  { %2308 = sst [smem:[#allocation26_spill]] %s2289_s6 }
   0x5   :  { %2309 = sst [smem:[#allocation27_spill]] %s2290_s7 }
   0x6   :  { %2310 = sst [smem:[#allocation28_spill]] %s2291_s8 }
   0x7   :  { %2311 = sst [smem:[#allocation29_spill]] %s2292_s9 }
   0x8   :  { %2312 = sst [smem:[#allocation30_spill]] %s2293_s10 }
   0x9   :  { %2313 = sst [smem:[#allocation31_spill]] %s2294_s11 }
   0xa   :  { %17 = vsyncpa [#allocation3], 0 }
   0xb   :  { %19 = vsyncpa [#allocation3 + $0x1], 0 }
   0xc   :  { %20 = vsyncpa [#allocation6], 0 }
   0xd   :  { %21 = vsyncpa [#allocation9], 0 }
   0xe   :  { %22 = vsyncpa [#allocation4], 0 }
   0xf   :  { %24 = vsyncpa [#allocation4 + $0x1], 0 }
  0x10   :  { %25 = vsyncpa [#allocation12], 0 }
  0x11   :  { %27 = vsyncpa [#allocation12 + $0x1], 0  ;;  %s1840_s17 = smov 0   ;;  %s1842_s18 = smov 0  }
  0x12   :  { %s1844_s19 = smov 0   ;;  %s1846_s20 = smov 0  }
  0x13   :  { %s1848_s21 = smov 0   ;;  %s1850_s22 = smov 0  }
  0x14   :  { %s1852_s23 = smov 0   ;;  %s1854_s24 = smov 0  }
  0x15 LB: > { %2314 = sst [smem:[#allocation19_spill]] %s1735_s17  ;;  %s1881_s25 = sadd.s32 4294967295, %s1763_s24   ;;  %s1763_s24 = sphi %s1854_s24, %s33_s24   ;;  %s1759_s23 = sphi %s1852_s23, %s2354_s23   ;;  %s1755_s22 = sphi %s1850_s22, %s2353_s22   ;;  %s1751_s21 = sphi %s1848_s21, %s2352_s21   ;;  %s1747_s20 = sphi %s1846_s20, %s2351_s20   ;;  %s1743_s19 = sphi %s1844_s19, %s2350_s19   ;;  %s1739_s18 = sphi %s1842_s18, %s2349_s18   ;;  %s1735_s17 = sphi %s1840_s17, %s2348_s17  }
  0x16   : > { %2315 = sst [smem:[#allocation20_spill]] %s1751_s21  ;;  %s2295_s26 = sadd.s32 4294967294, %s1763_s24  }
  0x17   : > { %p67_p0 = scmp.ne.s32.totalorder %s1739_s18, %s1735_s17  ;;  %p2300_p1 = scmp.eq.s32.totalorder %s1881_s25, 0 }
  0x18   : > { %p267_p3 = scmp.eq.s32.totalorder %s2295_s26, 3  ;;  %p1154_p5 = scmp.ge.s32.totalorder %s1763_s24, 1 }
  0x19   : > { %p1892_p4 = por %p2300_p1, %p67_p0  ;;  %p330_p7 = scmp.lt.s32.totalorder %s1763_s24, 5 }
  0x1a   : > { %p1897_p6 = por %p267_p3, %p67_p0  ;;  %s1765_s30 = smov [#allocation5]  }
  0x1b   : > { %s2316_s27 = scalar_select %p1892_p4, 1, 0 }
  0x1c   : > { %s2317_s28 = scalar_select %p1897_p6, 1, 0 }
  0x1d   : > { %p1902_p8 = pnand %p1154_p5, %p330_p7  ;;  %s348_s12 = sshll.u32 %s1765_s30, 4  ;;  %s1906_s12 = int_to_ptr.vmem [resolvable:$true] %s348_s12 }
  0x1e   : > { %2318 = sst [smem:[#allocation21_spill]] %s2317_s28  ;;  %s1766_s14 = smov [#allocation7]  }
  0x1f   : > { %s2319_s29 = scalar_select %p1902_p8, 1, 0 }
  0x20   : > { %p1348_p9 = pneg %p1902_p8  ;;  %s364_s15 = sshll.u32 %s1766_s14, 4  ;;  %s1916_s15 = int_to_ptr.vmem [resolvable:$true] %s364_s15 }
  0x21   : > { %s1767_s16 = smov [#allocation8]   ;;  %s2321_s3 = sld [smem:[#allocation23_spill]] }
  0x22   : > { %p1912_p10 = pnand %p1348_p9, %p2300_p1  ;;  %s1918_s26 = sshll.u32 %s1767_s16, 4  ;;  %s381_s26 = int_to_ptr.vmem [resolvable:$true] %s1918_s26 }
  0x24   : > { %p1928_p12 = pneg %p1912_p10 }
  0x27   : > { %s1483_s30 = scalar_lea.hbm %s2321_s3, 1024 }
  0x28   : > { %p1484_p11 = scmp.ne.s32.totalorder %s2321_s3, %s1483_s30  ;;  %p1490_p3 = scmp.lt.u32.totalorder %s1483_s30, %s2321_s3 }
  0x2a   : > { %p1486_p13 = pnand %p1928_p12, %p1484_p11 }
  0x2c   : > { %p1487_p0 = pneg %p1486_p13 }
  0x2e   : > { %p1492_p5 = pnand %p1490_p3, %p1487_p0 }
  0x30   : > { %1495 = shalt.err (!%p1492_p5)
}
  0x31   : > { %s1496_s8 = scalar_lea.vmem %s1906_s12, 1024  ;;  %p1504_p2 = scmp.lt.s32.totalorder %s1906_s12, %s1906_s12 }
  0x32   : > { %p1497_p7 = scmp.ne.s32.totalorder %s1906_s12, %s1496_s8  ;;  %p1505_p6 = scmp.lt.s32.totalorder %s1496_s8, %s1496_s8 }
  0x34   : > { %p1499_p9 = pnand %p1497_p7, %p1928_p12  ;;  %p1506_p11 = por %p1505_p6, %p1504_p2 }
  0x36   : > { %p1500_p1 = pneg %p1499_p9 }
  0x38   : > { %p1507_p13 = pnand %p1506_p11, %p1500_p1 }
  0x3a   : > { %1510 = shalt.err (!%p1507_p13)
}
  0x3b   : > { %s1768_s11 = smov 64   ;;  %s1769_s17 = smov 4  }
  0x3c   : > { %1351 = dma.hbm_to_vmem [thread:$0]  (!%p1912_p10), %s2321_s3, 1024, %s1906_s12, [#allocation6], %s1768_s11, %s1768_s11, %s1769_s17  }
  0x3d   : > { %s2323_s5 = sld [smem:[#allocation25_spill]] }
  0x43   : > { %s1511_s8 = scalar_lea.hbm %s2323_s5, 1024 }
  0x44   : > { %p1512_p1 = scmp.ne.s32.totalorder %s2323_s5, %s1511_s8  ;;  %p1518_p0 = scmp.lt.u32.totalorder %s1511_s8, %s2323_s5 }
  0x46   : > { %p1514_p2 = pnand %p1512_p1, %p1928_p12 }
  0x48   : > { %p1515_p6 = pneg %p1514_p2 }
  0x4a   : > { %p1520_p3 = pnand %p1518_p0, %p1515_p6 }
  0x4c   : > { %1523 = shalt.err (!%p1520_p3)
}
  0x4d   : > { %s1524_s12 = scalar_lea.vmem %s1916_s15, 1024  ;;  %p1532_p11 = scmp.lt.s32.totalorder %s1916_s15, %s1916_s15 }
  0x4e   : > { %p1525_p5 = scmp.ne.s32.totalorder %s1916_s15, %s1524_s12  ;;  %p1533_p13 = scmp.lt.s32.totalorder %s1524_s12, %s1524_s12 }
  0x50   : > { %p1527_p7 = pnand %p1525_p5, %p1928_p12  ;;  %p1534_p1 = por %p1533_p13, %p1532_p11 }
  0x52   : > { %p1528_p9 = pneg %p1527_p7 }
  0x54   : > { %p1535_p2 = pnand %p1534_p1, %p1528_p9 }
  0x56   : > { %1538 = shalt.err (!%p1535_p2)
}
  0x57   : > { %1354 = dma.hbm_to_vmem [thread:$0]  (!%p1912_p10), %s2323_s5, 1024, %s1916_s15, [#allocation6], %s1768_s11, %s1768_s11, %s1769_s17  }
  0x58   : > { %s2324_s7 = sld [smem:[#allocation27_spill]] }
  0x5e   : > { %s1539_s28 = scalar_lea.hbm %s2324_s7, 1024 }
  0x5f   : > { %p1540_p6 = scmp.ne.s32.totalorder %s2324_s7, %s1539_s28  ;;  %p1546_p5 = scmp.lt.u32.totalorder %s1539_s28, %s2324_s7 }
  0x61   : > { %p1542_p0 = pnand %p1540_p6, %p1928_p12 }
  0x63   : > { %p1543_p3 = pneg %p1542_p0 }
  0x65   : > { %p1548_p7 = pnand %p1546_p5, %p1543_p3 }
  0x67   : > { %1551 = shalt.err (!%p1548_p7)
}
  0x68   : > { %s1552_s12 = scalar_lea.vmem %s381_s26, 1024  ;;  %p1560_p1 = scmp.lt.s32.totalorder %s381_s26, %s381_s26 }
  0x69   : > { %p1553_p9 = scmp.ne.s32.totalorder %s381_s26, %s1552_s12  ;;  %p1561_p2 = scmp.lt.s32.totalorder %s1552_s12, %s1552_s12 }
  0x6b   : > { %p1555_p11 = pnand %p1553_p9, %p1928_p12  ;;  %p1562_p4 = por %p1561_p2, %p1560_p1 }
  0x6d   : > { %p1556_p13 = pneg %p1555_p11 }
  0x6f   : > { %p1563_p8 = pnand %p1562_p4, %p1556_p13 }
  0x71   : > { %1566 = shalt.err (!%p1563_p8)
}
  0x72   : > { %1357 = dma.hbm_to_vmem [thread:$0]  (!%p1912_p10), %s2324_s7, 1024, %s381_s26, [#allocation9], %s1768_s11, %s1768_s11, %s1769_s17  }
  0x73   : > { %s42_s9 = sadd.s32 1, %s1755_s22  ;;  %s45_s13 = sadd.s32 1, %s1759_s23 }
  0x74   : > { %p43_p4 = scmp.ge.s32.totalorder %s42_s9, 2  ;;  %s54_s6 = sadd.s32 1, %s1743_s19 }
  0x75   : > { %p61_p8 = scmp.ne.s32.totalorder %s1743_s19, %s1739_s18  ;;  %p62_p12 = scmp.eq.s32.totalorder %s1763_s24, 0 }
  0x76   : > { %s2356_s9 = smov (%p43_p4, %s42_s9), 0  ;;  %s2358_s13 = smov (!%p43_p4, %s45_s13), %s1759_s23 }
  0x77   : > { %s50_s10 = ssub.s32 %s1755_s22, %s2356_s9  ;;  %p47_p6 = scmp.ge.s32.totalorder %s2358_s13, 2 }
  0x78   : > { %p2325_p0 = scmp.eq.s32.totalorder %s1881_s25, 3  ;;  %p2017_p10 = por %p62_p12, %p61_p8 }
  0x79   : > { %p1375_p5 = scmp.lt.s32.totalorder %s1763_s24, 4  ;;  %s2360_s13 = smov (%p47_p6, %s2358_s13), 0 }
  0x7a   : > { %p2013_p3 = por %p2325_p0, %p61_p8  ;;  %2328 = sst [smem:[#allocation22_spill]] %s2360_s13 }
  0x7b   : > { %s397_s11 = sand.u32 1, %s1743_s19   ;;  %s1160_s17 = sshll.u32 %s1755_s22, 1 }
  0x7c   : > { %s49_s28 = ssub.s32 %s1759_s23, %s2360_s13  ;;  %s1159_s14 = sshll.u32 %s397_s11, 4 }
  0x7d   : > { %s51_s30 = sor.u32 %s50_s10, %s49_s28  ;;  %s1161_s16 = sshll.u32 %s1759_s23, 2 }
  0x7e   : > { %p52_p7 = scmp.eq.s32.totalorder %s51_s30, 0  ;;  %s401_s8 = scalar_lea.vmem [#allocation2], %s1159_s14 }
  0x7f   : > { %s410_s12 = sshll.u32 %s401_s8, 4  ;;  %s407_s4 = sadd.s32 %s1161_s16, %s1160_s17  ;;  %s2032_s12 = int_to_ptr.vmem [resolvable:$true] %s410_s12 }
  0x80   : > { %s2030_s15 = scalar_select %p52_p7, %s1743_s19, %s54_s6  }
  0x81   : > { %s1162_s3 = sshll.u32 %s407_s4, 7  ;;  %p2038_p9 = pnand %p1375_p5, %p2017_p10 }
  0x82   : > { %s2045_s10 = scalar_lea.hbm %s2283_s0, %s1162_s3  ;;  %s2047_s6 = scalar_lea.sflag [#allocation3], %s397_s11 }
  0x83   : > { %s1567_s17 = scalar_lea.hbm %s2045_s10, 256  ;;  %p1569_p13 = pneg %p2038_p9 }
  0x84   : > { %p1568_p11 = scmp.ne.s32.totalorder %s2045_s10, %s1567_s17  ;;  %s1572_s13 = scalar_lea.hbm %s2283_s0, 1024 }
  0x85   : > { %p1573_p4 = scmp.lt.u32.totalorder %s2045_s10, %s2283_s0  ;;  %p1574_p8 = scmp.lt.u32.totalorder %s1572_s13, %s1567_s17 }
  0x86   : > { %p1570_p1 = pnand %p1569_p13, %p1568_p11  ;;  %p1576_p6 = scmp.lt.u32.totalorder %s1567_s17, %s2045_s10 }
  0x87   : > { %p1575_p12 = por %p1574_p8, %p1573_p4 }
  0x88   : > { %p1571_p2 = pneg %p1570_p1 }
  0x89   : > { %p1577_p0 = por %p1576_p6, %p1575_p12 }
  0x8b   : > { %p1578_p10 = pnand %p1577_p0, %p1571_p2 }
  0x8d   : > { %1581 = shalt.err (!%p1578_p10)
}
  0x8e   : > { %s1582_s11 = scalar_lea.vmem %s2032_s12, 256  ;;  %s1770_s30 = smov [#allocation2]  }
  0x8f   : > { %p1583_p5 = scmp.ne.s32.totalorder %s2032_s12, %s1582_s11  ;;  %s1587_s14 = sshll.u32 %s1770_s30, 4  ;;  %s1588_s14 = int_to_ptr.vmem [resolvable:$false] %s1587_s14 }
  0x90   : > { %s1589_s16 = scalar_lea.vmem %s1588_s14, 512  ;;  %p1590_p1 = scmp.lt.s32.totalorder %s2032_s12, %s1588_s14 }
  0x91   : > { %p1585_p7 = pnand %p1583_p5, %p1569_p13  ;;  %p1591_p4 = scmp.lt.s32.totalorder %s1589_s16, %s1582_s11 }
  0x93   : > { %p1586_p11 = pneg %p1585_p7  ;;  %p1592_p8 = por %p1591_p4, %p1590_p1 }
  0x95   : > { %p1593_p12 = pnand %p1592_p8, %p1586_p11 }
  0x97   : > { %1596 = shalt.err (!%p1593_p12)
}
  0x98   : > { %s1771_s8 = smov 128   ;;  %s1772_s4 = smov 8  }
  0x99   : > { %1361 = dma.hbm_to_vmem [thread:$0]  (!%p2038_p9), %s2045_s10, 256, %s2032_s12, %s2047_s6, %s1771_s8, %s1771_s8, %s1772_s4  }
  0x9a   : > { %p2330_p13 = scmp.ne.s32.totalorder %s2319_s29, 0 }
  0x9b   : > { %s2078_s17 = sand.u32 (!%p2330_p13), 1, %s1739_s18   ;;  %p2331_p2 = scmp.ne.s32.totalorder (!%p2330_p13), %s2316_s27, 0 }
  0x9c   : > { %422 = sbr.rel (%p2330_p13) target bundleno = 769 (0x301), region = 56  ;;  %s1164_s26 = sshll.u32 (!%p2330_p13), %s2078_s17, 4 }
  0x9d   : > { %s425_s7 = scalar_lea.sflag (!%p2330_p13), [#allocation3], %s2078_s17  ;;  %s428_s13 = scalar_lea.vmem (!%p2330_p13), [#allocation2], %s1164_s26 }
  0xa3   : > { %1714 = dma.done.wait (%p2331_p2), %s425_s7, 256  }
  0xa4   : > { %1716 = vsyncadd (%p2331_p2), %s425_s7, 4294967040  ;;  %p2332_p6 = scmp.eq.s32.totalorder %s1881_s25, 0 }
  0xa6   : > { %1718 = dma.done.wait (%p2332_p6), [#allocation6], 2048   ;;  %p2333_p9 = pmov %p2332_p6 }
  0xa7   : > { %p2334_p0 = pmov %p2332_p6 }
  0xa8   : > { %1720 = vsyncadd (%p2333_p9), [#allocation6], 4294965248 }
  0xa9   : > { %1722 = dma.done.wait (%p2334_p0), [#allocation9], 1024   ;;  %p2335_p10 = pmov %p2334_p0 }
  0xaa   : > { %v494_v0 = vld [vmem:[%s428_s13] sm:$0xff]  ;;  %v495_v1 = vld [vmem:[%s428_s13 + $0x8] sm:$0xff]  ;;  %v1773_v4 = vmov 0.0   ;;  %vm1774_vm0 = vmmov 0   ;;  %s2336_s10 = sld [smem:[#allocation20_spill]]  ;;  %s2131_s6 = sshll.u32 %s2078_s17, 3 }
  0xab   : > { %1724 = vsyncadd (%p2335_p10), [#allocation9], 4294966272  ;;  %498 = vadd.xlane.f32.xlu0 %v494_v0  ;;  %v1455_v2 = vld [vmem:[#allocation5] sm:$0xff]   ;;  %1268 = vmatprep.subr.bf16.mxu0 %v1773_v4  ;;  %v1457_v5 = vld [vmem:[#allocation5 + $0x8] sm:$0xff]   ;;  %s1209_s3 = sshll.u32 %s1747_s20, 1  ;;  %s2337_s14 = sld [smem:[#allocation24_spill]] }
  0xac   : > { %v1456_v3 = vld [vmem:[#allocation7] sm:$0xff]   ;;  %1288 = vmatprep.subr.bf16.mxu1 %v1773_v4  ;;  %1269 = vmatpush3.bf16.msra.mxu0 %v1455_v2  ;;  %v1458_v14 = vld [vmem:[#allocation7 + $0x8] sm:$0xff]   ;;  %v1459_v15 = vld [vmem:[#allocation5 + $0x10] sm:$0xff]   ;;  %s2338_s26 = sld [smem:[#allocation26_spill]]  ;;  %s474_s7 = scalar_lea.vmem [#allocation10], %s2131_s6 }
  0xad   : > { %1289 = vmatpush3.bf16.msra.mxu1 %v1456_v3  ;;  %1270 = vmatprep.subr.bf16.mxu0 %v1773_v4  ;;  %v1460_v16 = vld [vmem:[#allocation7 + $0x10] sm:$0xff]   ;;  %v1461_v17 = vld [vmem:[#allocation5 + $0x18] sm:$0xff]   ;;  %v1463_v19 = vld [vmem:[#allocation5 + $0x20] sm:$0xff]   ;;  %s930_s13 = sshll.u32 %s474_s7, 4  ;;  %s481_s5 = scalar_lea.vmem [#allocation11], %s2131_s6  ;;  %s2146_s13 = int_to_ptr.vmem [resolvable:$true] %s930_s13 }
  0xae   : > { %1290 = vmatprep.subr.bf16.mxu1 %v1773_v4  ;;  %v1462_v18 = vld [vmem:[#allocation7 + $0x18] sm:$0xff]   ;;  %v1464_v20 = vld [vmem:[#allocation7 + $0x20] sm:$0xff]   ;;  %1284 = vmatprep.mubr.msk.bf16.mxu0 %vm1774_vm0, %v1773_v4  ;;  %v1465_v21 = vld [vmem:[#allocation5 + $0x28] sm:$0xff]   ;;  %s948_s27 = sshll.u32 %s481_s5, 4  ;;  %s909_s29 = sand.u32 1, %s1881_s25   ;;  %s2148_s27 = int_to_ptr.vmem [resolvable:$true] %s948_s27 }
  0xaf   : > { %500 = vadd.xlane.f32.xlu0 %v495_v1  ;;  %1304 = vmatprep.mubr.msk.bf16.mxu1 %vm1774_vm0, %v1773_v4  ;;  %v1466_v22 = vld [vmem:[#allocation7 + $0x28] sm:$0xff]   ;;  %v1467_v23 = vld [vmem:[#allocation5 + $0x30] sm:$0xff]   ;;  %v1469_v25 = vld [vmem:[#allocation5 + $0x38] sm:$0xff]   ;;  %s2340_s30 = sld [smem:[#allocation29_spill]]  ;;  %s1597_s8 = scalar_lea.vmem %s2148_s27, 128 }
  0xb0   : > { %1271 = vmatpush3.bf16.msra.mxu0 %v1457_v5  ;;  %v1468_v24 = vld [vmem:[#allocation7 + $0x30] sm:$0xff]   ;;  %v1470_v26 = vld [vmem:[#allocation7 + $0x38] sm:$0xff]   ;;  %v1171_v35 = vld [vmem:[%s2284_s1] ss:$0 sm:$0xff]  ;;  %s1210_s28 = sshll.u32 %s2336_s10, 2  ;;  %s2339_s10 = sld [smem:[#allocation30_spill]] }
  0xb1   : > { %1272 = vmatprep.subr.bf16.mxu0 %v1773_v4  ;;  %1291 = vmatpush3.bf16.msra.mxu1 %v1458_v14  ;;  %v1172_v39 = vld [vmem:[%s2285_s2] ss:$0 sm:$0xff]  ;;  %v1472_v45 = vld [vmem:[#allocation8 + $0x8] sm:$0xff]   ;;  %v1473_v46 = vld [vmem:[#allocation8 + $0x10] sm:$0xff]   ;;  %s927_s16 = sadd.s32 %s1210_s28, %s1209_s3  ;;  %p1598_p5 = scmp.ne.s32.totalorder %s2148_s27, %s1597_s8 }
  0xb2   : > { %1292 = vmatprep.subr.bf16.mxu1 %v1773_v4  ;;  %v1471_v43 = vld [vmem:[#allocation8] sm:$0xff]   ;;  %v1474_v47 = vld [vmem:[#allocation8 + $0x18] sm:$0xff]   ;;  %v1476_v49 = vld [vmem:[#allocation8 + $0x28] sm:$0xff]   ;;  %s2144_s20 = sshll.u32 %s927_s16, 6  ;;  %s2162_s16 = scalar_lea.sflag [#allocation12], %s909_s29 }
  0xb3   : > { %v1475_v48 = vld [vmem:[#allocation8 + $0x20] sm:$0xff]   ;;  %v1477_v50 = vld [vmem:[#allocation8 + $0x30] sm:$0xff]   ;;  %v1478_v51 = vld [vmem:[#allocation8 + $0x38] sm:$0xff]   ;;  %p1599_p7 = pnand %p1598_p5, %p2013_p3  ;;  %s1775_s4 = smov [#allocation11]  }
  0xb4   : > { %1273 = vmatpush3.bf16.msra.mxu0 %v1459_v15  ;;  %v1173_v52 = vld [vmem:[%s2337_s14] ss:$0 sm:$0xff] }
  0xb5   : > { %1293 = vmatpush3.bf16.msra.mxu1 %v1460_v16  ;;  %1274 = vmatprep.subr.bf16.mxu0 %v1773_v4  ;;  %v1184_v54 = vld [vmem:[%s2338_s26] ss:$0 sm:$0xff]  ;;  %s2160_s14 = scalar_lea.hbm %s2340_s30, %s2144_s20  ;;  %p1600_p11 = pneg %p1599_p7 }
  0xb6   : > { %1294 = vmatprep.subr.bf16.mxu1 %v1773_v4  ;;  %s2154_s3 = scalar_lea.hbm %s2339_s10, %s2144_s20  ;;  %s1601_s26 = sshll.u32 %s1775_s4, 4  ;;  %s1602_s26 = int_to_ptr.vmem [resolvable:$false] %s1601_s26 }
  0xb7   : > { %s1603_s25 = scalar_lea.vmem %s1602_s26, 256  ;;  %p1604_p1 = scmp.lt.s32.totalorder %s2148_s27, %s1602_s26 }
  0xb8   : > { %1275 = vmatpush3.bf16.msra.mxu0 %v1461_v17  ;;  %p1605_p4 = scmp.lt.s32.totalorder %s1603_s25, %s1597_s8 }
  0xb9   : > { %1295 = vmatpush3.bf16.msra.mxu1 %v1462_v18  ;;  %1276 = vmatprep.subr.bf16.mxu0 %v1773_v4 }
  0xba   : > { %1296 = vmatprep.subr.bf16.mxu1 %v1773_v4  ;;  %p1606_p8 = por %p1605_p4, %p1604_p1 }
  0xbc   : > { %1277 = vmatpush3.bf16.msra.mxu0 %v1463_v19  ;;  %p1607_p12 = pnand %p1606_p8, %p1600_p11 }
  0xbd   : > { %1297 = vmatpush3.bf16.msra.mxu1 %v1464_v20  ;;  %1278 = vmatprep.subr.bf16.mxu0 %v1773_v4 }
  0xbe   : > { %1298 = vmatprep.subr.bf16.mxu1 %v1773_v4 }
  0xc0   : > { %1279 = vmatpush3.bf16.msra.mxu0 %v1465_v21 }
  0xc1   : > { %1299 = vmatpush3.bf16.msra.mxu1 %v1466_v22  ;;  %1280 = vmatprep.subr.bf16.mxu0 %v1773_v4 }
  0xc2   : > { %1300 = vmatprep.subr.bf16.mxu1 %v1773_v4 }
  0xc4   : > { %1281 = vmatpush3.bf16.msra.mxu0 %v1467_v23 }
  0xc5   : > { %1301 = vmatpush3.bf16.msra.mxu1 %v1468_v24  ;;  %1282 = vmatprep.subr.bf16.mxu0 %v1773_v4 }
  0xc6   : > { %1302 = vmatprep.subr.bf16.mxu1 %v1773_v4 }
  0xc8   : > { %1283 = vmatpush3.bf16.msra.mxu0 %v1469_v25 }
  0xc9   : > { %1303 = vmatpush3.bf16.msra.mxu1 %v1470_v26  ;;  %1308 = vmatprep.subr.bf16.mxu0 %v1773_v4 }
 0x138   : > { %v499_v6 = vpop.xlane.xlu0 %498 }
 0x139   : > { %v503_v7 = vmul.f32 0.0078125, %v499_v6 }
 0x13b   : > { %v505_v8 = vsub.f32 %v494_v0, %v503_v7 }
 0x13c   : > { %v501_v9 = vpop.xlane.xlu0 %500 }
 0x13d   : > { %v504_v10 = vmul.f32 0.0078125, %v501_v9  ;;  %v507_v11 = vmul.f32 %v505_v8, %v505_v8 }
 0x13f   : > { %v506_v12 = vsub.f32 %v495_v1, %v504_v10  ;;  %509 = vadd.xlane.f32.xlu1 %v507_v11 }
 0x141   : > { %v508_v13 = vmul.f32 %v506_v12, %v506_v12 }
 0x143   : > { %511 = vadd.xlane.f32.xlu1 %v508_v13 }
 0x1cc   : > { %v510_v27 = vpop.xlane.xlu1 %509 }
 0x1cd   : > { %v513_v28 = vmul.f32 0.0078125, %v510_v27 }
 0x1cf   : > { %v515_v29 = vadd.f32 1e-05, %v513_v28 }
 0x1d0   : > { %v512_v30 = vpop.xlane.xlu1 %511 }
 0x1d1   : > { %1479 = vrsqrt.f32 %v515_v29  ;;  %v514_v31 = vmul.f32 0.0078125, %v512_v30 }
 0x1d3   : > { %v516_v32 = vadd.f32 1e-05, %v514_v31 }
 0x1d5   : > { %1481 = vrsqrt.f32 %v516_v32 }
 0x1db   : > { %v1480_v33 = vpop.eup %1479 }
 0x1dc   : > { %v519_v34 = vmul.f32 %v1480_v33, %v505_v8 }
 0x1de   : > { %v527_v38 = vmul.f32 %v1171_v35, %v519_v34 }
 0x1df   : > { %v1482_v36 = vpop.eup %1481 }
 0x1e0   : > { %v520_v37 = vmul.f32 %v1482_v36, %v506_v12  ;;  %v535_v41 = vadd.f32 %v1172_v39, %v527_v38 }
 0x1e2   : > { %v528_v40 = vmul.f32 %v1171_v35, %v520_v37 }
 0x1e4   : > { %v536_v42 = vadd.f32 %v1172_v39, %v528_v40 }
 0x1e6   : > { %v537_v44 = vpack.c.bf16 %v536_v42, %v535_v41 }
 0x1e8   : > { %1285 = vmatmul.mubr.bf16.vlgmr.msra.gmra.mrb[0].mxu0 %v537_v44  ;;  %1305 = vmatmul.mubr.bf16.vlgmr.msra.gmra.mrb[0].mxu1 %v537_v44 }
 0x1e9   : > { %1309 = vmatpush3.bf16.msra.mxu0 %v1471_v43  ;;  %1324 = vmatprep.mubr.msk.bf16.mxu0 %vm1774_vm0, %v1773_v4 }
 0x1ea   : > { %1310 = vmatprep.subr.bf16.mxu0 %v1773_v4 }
 0x1ed   : > { %1311 = vmatpush3.bf16.msra.mxu0 %v1472_v45 }
 0x1ee   : > { %1312 = vmatprep.subr.bf16.mxu0 %v1773_v4 }
 0x1f1   : > { %1313 = vmatpush3.bf16.msra.mxu0 %v1473_v46 }
 0x1f2   : > { %1314 = vmatprep.subr.bf16.mxu0 %v1773_v4 }
 0x1f5   : > { %1315 = vmatpush3.bf16.msra.mxu0 %v1474_v47 }
 0x1f6   : > { %1316 = vmatprep.subr.bf16.mxu0 %v1773_v4 }
 0x1f9   : > { %1317 = vmatpush3.bf16.msra.mxu0 %v1475_v48 }
 0x1fa   : > { %1318 = vmatprep.subr.bf16.mxu0 %v1773_v4 }
 0x1fd   : > { %1319 = vmatpush3.bf16.msra.mxu0 %v1476_v49 }
 0x1fe   : > { %1320 = vmatprep.subr.bf16.mxu0 %v1773_v4 }
 0x201   : > { %1321 = vmatpush3.bf16.msra.mxu0 %v1477_v50 }
 0x202   : > { %1322 = vmatprep.subr.bf16.mxu0 %v1773_v4 }
 0x205   : > { %1323 = vmatpush3.bf16.msra.mxu0 %v1478_v51 }
 0x208   : > { %1325 = vmatmul.mubr.bf16.vlgmr.msra.gmra.mrb[4].mxu0 %v537_v44 }
 0x2bb   : > { %v643_v53 = vpop.f32.mrb[0].mxu0  ;;  %v765_v55 = vpop.f32.mrb[0].mxu1 }
 0x2bc   : > { %v1286_v56 = vpop.f32.mrb[1].mxu0  ;;  %v1306_v57 = vpop.f32.mrb[1].mxu1  ;;  %v644_v60 = vadd.f32 %v1173_v52, %v643_v53  ;;  %v766_v61 = vadd.f32 %v1184_v54, %v765_v55 }
 0x2bd   : > { %v646_v58 = vpop.f32.mrb[2].mxu0  ;;  %v768_v59 = vpop.f32.mrb[2].mxu1 }
 0x2be   : > { %v647_v62 = vadd.f32 %v1173_v52, %v646_v58  ;;  %v769_v63 = vadd.f32 %v1184_v54, %v768_v59  ;;  %v1287_v0 = vpop.f32.mrb[3].mxu0  ;;  %v1307_v1 = vpop.f32.mrb[3].mxu1 }
 0x2c0   : > { %v1229_v2 = vpack.c.bf16 %v647_v62, %v644_v60  ;;  %v1234_v3 = vpack.c.bf16 %v769_v63, %v766_v61 }
 0x2c2   : > { %1230 = vst [vmem:[%s474_s7] sm:$0xff] %v1229_v2   ;;  %1235 = vst [vmem:[%s481_s5] sm:$0xff] %v1234_v3  }
 0x2c3   : > { %1610 = shalt.err (!%p1607_p12)
}
 0x2c4   : > { %s1611_s7 = scalar_lea.hbm %s2154_s3, 128  ;;  %s1615_s12 = scalar_lea.hbm %s2339_s10, 512 }
 0x2c5   : > { %p1612_p13 = scmp.ne.s32.totalorder %s2154_s3, %s1611_s7  ;;  %p1616_p9 = scmp.lt.u32.totalorder %s2154_s3, %s2339_s10 }
 0x2c6   : > { %p1617_p0 = scmp.lt.u32.totalorder %s1615_s12, %s1611_s7  ;;  %p1619_p5 = scmp.lt.u32.totalorder %s1611_s7, %s2154_s3 }
 0x2c7   : > { %p1613_p2 = pnand %p1612_p13, %p2013_p3 }
 0x2c8   : > { %p1618_p10 = por %p1617_p0, %p1616_p9 }
 0x2c9   : > { %p1614_p6 = pneg %p1613_p2 }
 0x2ca   : > { %p1620_p7 = por %p1619_p5, %p1618_p10 }
 0x2cc   : > { %p1621_p11 = pnand %p1620_p7, %p1614_p6 }
 0x2ce   : > { %1624 = shalt.err (!%p1621_p11)
}
 0x2cf   : > { %s1776_s8 = smov 64   ;;  %s1777_s4 = smov 4  }
 0x2d0   : > { %1343 = dma.vmem_to_hbm [thread:$0]  (%p2013_p3), %s2148_s27, 128, %s2154_s3, %s2162_s16, %s1776_s8, %s1776_s8, %s1777_s4  }
 0x2d1   : > { %s905_s26 = scalar_lea.sflag [#allocation4], %s2078_s17  ;;  %s1625_s25 = scalar_lea.vmem %s2146_s13, 128 }
 0x2d2   : > { %p1626_p1 = scmp.ne.s32.totalorder %s2146_s13, %s1625_s25  ;;  %s1778_s7 = smov [#allocation10]  }
 0x2d3   : > { %s1629_s5 = sshll.u32 %s1778_s7, 4  ;;  %s1630_s5 = int_to_ptr.vmem [resolvable:$false] %s1629_s5 }
 0x2d4   : > { %p1627_p4 = pnand %p1626_p1, %p2013_p3  ;;  %s1631_s29 = scalar_lea.vmem %s1630_s5, 256 }
 0x2d5   : > { %p1632_p12 = scmp.lt.s32.totalorder %s2146_s13, %s1630_s5  ;;  %p1633_p13 = scmp.lt.s32.totalorder %s1631_s29, %s1625_s25 }
 0x2d6   : > { %p1628_p8 = pneg %p1627_p4 }
 0x2d7   : > { %p1634_p2 = por %p1633_p13, %p1632_p12 }
 0x2d9   : > { %p1635_p6 = pnand %p1634_p2, %p1628_p8 }
 0x2db   : > { %1638 = shalt.err (!%p1635_p6)
}
 0x2dc   : > { %s1639_s27 = scalar_lea.hbm %s2160_s14, 128  ;;  %s1643_s28 = scalar_lea.hbm %s2340_s30, 512 }
 0x2dd   : > { %p1640_p9 = scmp.ne.s32.totalorder %s2160_s14, %s1639_s27  ;;  %p1644_p5 = scmp.lt.u32.totalorder %s2160_s14, %s2340_s30 }
 0x2de   : > { %p1645_p7 = scmp.lt.u32.totalorder %s1643_s28, %s1639_s27  ;;  %p1647_p1 = scmp.lt.u32.totalorder %s1639_s27, %s2160_s14 }
 0x2df   : > { %p1641_p0 = pnand %p1640_p9, %p2013_p3 }
 0x2e0   : > { %p1646_p11 = por %p1645_p7, %p1644_p5 }
 0x2e1   : > { %p1642_p10 = pneg %p1641_p0 }
 0x2e2   : > { %p1648_p4 = por %p1647_p1, %p1646_p11 }
 0x2e4   : > { %p1649_p8 = pnand %p1648_p4, %p1642_p10 }
 0x2e6   : > { %1652 = shalt.err (!%p1649_p8)
}
 0x2e7   : > { %1342 = dma.vmem_to_hbm [thread:$0]  (%p2013_p3), %s2146_s13, 128, %s2160_s14, %s905_s26, %s1776_s8, %s1776_s8, %s1777_s4   ;;  %v887_v5 = vpop.f32.mrb[4].mxu0 }
 0x2e8   : > { %s2341_s29 = sld [smem:[#allocation28_spill]]  ;;  %v1326_v6 = vpop.f32.mrb[5].mxu0  ;;  %s488_s27 = scalar_lea.vmem [#allocation13], %s2131_s6 }
 0x2e9   : > { %v890_v7 = vpop.f32.mrb[6].mxu0  ;;  %s966_s3 = sshll.u32 %s488_s27, 4  ;;  %s2342_s28 = sld [smem:[#allocation31_spill]]  ;;  %s2220_s3 = int_to_ptr.vmem [resolvable:$true] %s966_s3 }
 0x2ea   : > { %v1327_v10 = vpop.f32.mrb[7].mxu0  ;;  %s1653_s14 = scalar_lea.vmem %s2220_s3, 128  ;;  %s1779_s6 = smov [#allocation13]  }
 0x2eb   : > { %p1654_p12 = scmp.ne.s32.totalorder %s2220_s3, %s1653_s14  ;;  %s1657_s26 = sshll.u32 %s1779_s6, 4  ;;  %s1658_s26 = int_to_ptr.vmem [resolvable:$false] %s1657_s26 }
 0x2ec   : > { %s1659_s11 = scalar_lea.vmem %s1658_s26, 256  ;;  %p1660_p6 = scmp.lt.s32.totalorder %s2220_s3, %s1658_s26 }
 0x2ed   : > { %p1655_p13 = pnand %p1654_p12, %p2013_p3  ;;  %p1661_p9 = scmp.lt.s32.totalorder %s1659_s11, %s1653_s14 }
 0x2ee   : > { %v1195_v4 = vld [vmem:[%s2341_s29] ss:$0 sm:$0xff] }
 0x2ef   : > { %v888_v8 = vadd.f32 %v1195_v4, %v887_v5  ;;  %v891_v9 = vadd.f32 %v1195_v4, %v890_v7  ;;  %s2226_s13 = scalar_lea.hbm %s2342_s28, %s2144_s20  ;;  %p1656_p2 = pneg %p1655_p13 }
 0x2f0   : > { %p1662_p0 = por %p1661_p9, %p1660_p6 }
 0x2f1   : > { %v1239_v11 = vpack.c.bf16 %v891_v9, %v888_v8 }
 0x2f2   : > { %p1663_p10 = pnand %p1662_p0, %p1656_p2 }
 0x2f3   : > { %1240 = vst [vmem:[%s488_s27] sm:$0xff] %v1239_v11  }
 0x2f4   : > { %1666 = shalt.err (!%p1663_p10)
}
 0x2f5   : > { %s1667_s20 = scalar_lea.hbm %s2226_s13, 128  ;;  %s1671_s5 = scalar_lea.hbm %s2342_s28, 512 }
 0x2f6   : > { %p1668_p5 = scmp.ne.s32.totalorder %s2226_s13, %s1667_s20  ;;  %p1672_p1 = scmp.lt.u32.totalorder %s2226_s13, %s2342_s28 }
 0x2f7   : > { %p1673_p4 = scmp.lt.u32.totalorder %s1671_s5, %s1667_s20  ;;  %p1675_p12 = scmp.lt.u32.totalorder %s1667_s20, %s2226_s13 }
 0x2f8   : > { %p1669_p7 = pnand %p1668_p5, %p2013_p3 }
 0x2f9   : > { %p1674_p8 = por %p1673_p4, %p1672_p1 }
 0x2fa   : > { %p1670_p11 = pneg %p1669_p7 }
 0x2fb   : > { %p1676_p13 = por %p1675_p12, %p1674_p8 }
 0x2fd   : > { %p1677_p2 = pnand %p1676_p13, %p1670_p11 }
 0x2ff   : > { %1680 = shalt.err (!%p1677_p2)
}
 0x300   : > { %1344 = dma.vmem_to_hbm [thread:$0]  (%p2013_p3), %s2220_s3, 128, %s2226_s13, %s2162_s16, %s1776_s8, %s1776_s8, %s1777_s4  }
 0x301 PF: > { %s2343_s17 = sld [smem:[#allocation19_spill]]  ;;  %s2344_s12 = sld [smem:[#allocation21_spill]] }
 0x302   : > { %p1379_p6 = scmp.ge.s32.totalorder %s1763_s24, 2 }
 0x307   : > { %s981_s14 = sand.u32 1, %s2343_s17   ;;  %p2345_p9 = scmp.ne.s32.totalorder %s2344_s12, 0 }
 0x308   : > { %s982_s6 = scalar_lea.sflag [#allocation4], %s981_s14 }
 0x309   : > { %p1363_p0 = pnand %p1379_p6, %p2345_p9 }
 0x30b   : > { %1726 = dma.done.wait (!%p1363_p0), %s982_s6, 128  }
 0x30c   : > { %1728 = vsyncadd (!%p1363_p0), %s982_s6, 4294967168  ;;  %s2346_s21 = sadd.s32 4294967294, %s1763_s24  }
 0x30d   : > { %s990_s26 = sand.u32 1, %s2346_s21  }
 0x30e   : > { %s991_s11 = scalar_lea.sflag [#allocation12], %s990_s26 }
 0x30f   : > { %1730 = dma.done.wait (!%p1363_p0), %s991_s11, 256  }
 0x310   : > { %1732 = vsyncadd (!%p1363_p0), %s991_s11, 4294967040  ;;  %s33_s24 = sadd.s32 1, %s1763_s24   ;;  %s2347_s16 = sld [smem:[#allocation22_spill]] }
 0x311   : > { %p30_p3 = scmp.ge.s32.totalorder %s33_s24, 6   ;;  %s2348_s17 = smov %s1739_s18 }
 0x312   : > { %s2349_s18 = smov %s1743_s19  ;;  %s2350_s19 = smov %s2030_s15 }
 0x313   : > { %s2351_s20 = smov %s1755_s22  ;;  %s2352_s21 = smov %s1759_s23 }
 0x314   : > { %s2353_s22 = smov %s2356_s9  ;;  %32 = sbr.rel (!%p30_p3) target bundleno = 21 (0x15), region = 145 }
 0x316   : > { %s2354_s23 = smov %s2347_s16 }
 0x31b   :  { %1005 = vsyncpa [#allocation3], 1 }
 0x31c   :  { %1007 = vsyncpa [#allocation3 + $0x1], 1 }
 0x31d   :  { %1008 = vsyncpa [#allocation6], 1 }
 0x31e   :  { %1009 = vsyncpa [#allocation9], 1 }
 0x31f   :  { %1010 = vsyncpa [#allocation4], 1 }
 0x320   :  { %1012 = vsyncpa [#allocation4 + $0x1], 1 }
 0x321   :  { %1013 = vsyncpa [#allocation12], 1 }
 0x322   :  { %1015 = vsyncpa [#allocation12 + $0x1], 1 }

</bundles_post_ra>
